<compile_context>
chip_gen: v6e
topology: v6e:2x2x1
jax: 0.10.0
libtpu: 0.0.40
codegen_flags: <defaults>
</compile_context>

<pallas_src>
import functools

import jax
import jax.numpy as jnp
from jax.experimental import pallas as pl
from jax.experimental.pallas import tpu as pltpu


def _ca_block_kernel(x_ref, w1_ref, shift_ref, wh_ref, ww_ref, o_ref,
                     *, bt, H, W, inv_w, inv_h, cdt):
    """One grid step: bt samples, each a lane-dense (C, H*W) slab."""
    HW = H * W

    w1 = w1_ref[...]          # (mid, C)  conv_1x1 weight with BN scale folded
    wh = wh_ref[...]          # (C, mid)  F_h weight
    ww = ww_ref[...]          # (C, mid)  F_w weight
    shift = shift_ref[...]    # (mid, 1)  folded BN shift
    mid = shift.shape[0]
    # Hoisted broadcasts (JAX does not CSE broadcast_in_dim inside loops).
    shift_h = jnp.broadcast_to(shift, (mid, H))
    shift_w = jnp.broadcast_to(shift, (mid, W))

    # -- 0/1 expand / pool matrices generated in-kernel (no HBM traffic) -----
    # exp_h[h, p] = (p // W == h)  via a range compare (no integer division).
    col_i = jax.lax.broadcasted_iota(jnp.int32, (H, HW), 1)
    row_i = jax.lax.broadcasted_iota(jnp.int32, (H, HW), 0)
    exp_h = ((col_i >= row_i * W) & (col_i < row_i * W + W)).astype(cdt)  # (H, HW)

    # exp_w[w, p] = (p % W == w) via an exact f32 floor-division trick
    # (all values < 2^24, so the arithmetic below is exact).
    col_f = jax.lax.broadcasted_iota(jnp.int32, (W, HW), 1).astype(jnp.float32)
    row_f = jax.lax.broadcasted_iota(jnp.int32, (W, HW), 0).astype(jnp.float32)
    w_of = col_f - jnp.floor(col_f / float(W)) * float(W)
    exp_w = (w_of == row_f).astype(cdt)                                   # (W, HW)

    nt_dims = (((1,), (1,)), ((), ()))   # contract the HW axis of both operands

    def body(b, carry):
        xb = x_ref[b]                                                 # (C, HW)

        # -- pooled descriptors (mean over W / mean over H) via MXU ----------
        x_h = jax.lax.dot_general(xb, exp_h, nt_dims,
                                  preferred_element_type=jnp.float32) * inv_w  # (C, H)
        x_w = jax.lax.dot_general(xb, exp_w, nt_dims,
                                  preferred_element_type=jnp.float32) * inv_h  # (C, W)

        # -- conv_1x1 (+ folded BN) + ReLU, H-part and W-part separately -----
        y_h = jnp.maximum(
            jnp.dot(w1, x_h, preferred_element_type=jnp.float32) + shift_h, 0.0)
        y_w = jnp.maximum(
            jnp.dot(w1, x_w, preferred_element_type=jnp.float32) + shift_w, 0.0)

        # -- F_h / F_w + sigmoid --------------------------------------------
        s_h = jax.nn.sigmoid(
            jnp.dot(wh, y_h, preferred_element_type=jnp.float32))       # (C, H)
        s_w = jax.nn.sigmoid(
            jnp.dot(ww, y_w, preferred_element_type=jnp.float32))       # (C, W)

        # -- broadcast gates back to the flat layout via MXU; 2 slab passes --
        g = (jnp.dot(s_h.astype(cdt), exp_h, preferred_element_type=jnp.float32) *
             jnp.dot(s_w.astype(cdt), exp_w, preferred_element_type=jnp.float32))

        o_ref[b] = (xb * g).astype(o_ref.dtype)        # lane-dense store
        return carry

    if bt == 1:
        body(0, None)
    else:
        # fori_loop bounds live ranges for large bt; fully unroll small bt.
        jax.lax.fori_loop(0, bt, body, None, unroll=(bt <= 4))


def _vmem_budget_bytes():
    """Per-generation VMEM budget: 0.75 * physical capacity, safe fallback."""
    cap = None
    try:
        info = pltpu.get_tpu_info()
        cap = getattr(info, "vmem_capacity_bytes", None)
    except Exception:
        cap = None
    if not cap:
        return 48 << 20            # conservative: fits every TPU generation
    return int(0.75 * cap)


def _choose_bt(B, C, H, W, itemsize, vmem_budget):
    """Samples per grid step.

    Large enough to amortize the ~0.35 us per-step pipeline overhead (~4 MiB
    of x per step), small enough that double-buffered in/out blocks plus f32
    temporaries stay inside the VMEM budget, and preferring divisors of B
    that keep the number of grid steps even (two v7x TensorCores)."""
    HW = H * W
    per_sample = max(C * HW * itemsize, 1)
    fixed = 2 * HW * (H + W) * 4 + 4 * C * HW * 4 + (4 << 20)
    bt_vmem = max(1, (vmem_budget - fixed) // (4 * per_sample))
    bt_target = max(1, (4 << 20) // per_sample)        # ~4 MiB of x per step
    cap = int(min(B, bt_vmem, bt_target))
    if B >= 2:
        cap = max(1, min(cap, B // 2))                  # keep >= 2 grid steps
    divisors = [d for d in range(1, B + 1) if B % d == 0 and d <= cap]
    if not divisors:
        return 1
    best = max(divisors)
    even = [d for d in divisors if (B // d) % 2 == 0]
    if even and max(even) * 2 >= best:                  # even step count, if cheap
        best = max(even)
    return best


def ca_block_pallas(x, w1, bn_gamma, bn_beta, bn_mean, bn_var, wh, ww,
                    eps=1e-5):
    """x: (B, C, H, W).  Returns (B, C, H, W).  Eval-mode BN semantics."""
    B, C, H, W = x.shape
    mid = w1.shape[0]
    HW = H * W
    itemsize = jnp.dtype(x.dtype).itemsize

    # -- fold eval-mode BatchNorm: scale into w1, shift passed separately ----
    inv_std = 1.0 / jnp.sqrt(bn_var.astype(jnp.float32) + eps)
    scale = bn_gamma.astype(jnp.float32) * inv_std                  # (mid,)
    w1s = scale[:, None] * w1.astype(jnp.float32)                   # (mid, C)
    shift = (bn_beta.astype(jnp.float32)
             - bn_mean.astype(jnp.float32) * scale).reshape(mid, 1)

    # -- flatten spatial dims (free, contiguous in HBM); lane-dense layout ---
    x_flat = x.reshape(B, C, HW)
    cdt = x.dtype if x.dtype in (jnp.float32, jnp.bfloat16) else jnp.float32

    vmem_budget = _vmem_budget_bytes()
    bt = _choose_bt(B, C, H, W, itemsize, vmem_budget)
    grid = (B // bt,)

    fixed_bytes = 2 * HW * (H + W) * 4 + 4 * C * HW * 4 + (4 << 20)
    needed = 4 * bt * C * HW * itemsize + fixed_bytes
    vmem_limit = int(min(vmem_budget, max(needed, 16 << 20)))

    kernel = functools.partial(_ca_block_kernel, bt=bt, H=H, W=W,
                               inv_w=1.0 / W, inv_h=1.0 / H, cdt=cdt)

    out_flat = pl.pallas_call(
        kernel,
        out_shape=jax.ShapeDtypeStruct((B, C, HW), x.dtype),
        grid_spec=pltpu.PrefetchScalarGridSpec(
            num_scalar_prefetch=0,
            grid=grid,
            in_specs=[
                pl.BlockSpec((bt, C, HW), lambda i: (i, 0, 0)),   # x (flat)
                pl.BlockSpec((mid, C), lambda i: (0, 0)),         # conv_1x1 (scaled)
                pl.BlockSpec((mid, 1), lambda i: (0, 0)),         # BN shift
                pl.BlockSpec((C, mid), lambda i: (0, 0)),         # F_h weight
                pl.BlockSpec((C, mid), lambda i: (0, 0)),         # F_w weight
            ],
            out_specs=pl.BlockSpec((bt, C, HW), lambda i: (i, 0, 0)),
        ),
        compiler_params=pltpu.CompilerParams(
            dimension_semantics=("parallel",),
            vmem_limit_bytes=vmem_limit,
        ),
    )(x_flat, w1s, shift, wh.astype(jnp.float32), ww.astype(jnp.float32))

    return out_flat.reshape(B, C, H, W)


def ca_block_reference(x, w1, bn_gamma, bn_beta, bn_mean, bn_var, wh, ww,
                       eps=1e-5):
    """Pure-JAX reference mirroring the PyTorch forward (eval-mode BN)."""
    B, C, H, W = x.shape
    x_h = jnp.mean(x, axis=3)                          # (B, C, H)
    x_w = jnp.mean(x, axis=2)                          # (B, C, W)
    cat = jnp.concatenate([x_h, x_w], axis=2)          # (B, C, H+W)
    y = jnp.einsum('mc,bcl->bml', w1, cat)             # (B, mid, H+W)
    y = (y - bn_mean[None, :, None]) / jnp.sqrt(bn_var[None, :, None] + eps)
    y = y * bn_gamma[None, :, None] + bn_beta[None, :, None]
    y = jnp.maximum(y, 0.0)
    y_h, y_w = y[:, :, :H], y[:, :, H:]
    s_h = jax.nn.sigmoid(jnp.einsum('cm,bml->bcl', wh, y_h))   # (B, C, H)
    s_w = jax.nn.sigmoid(jnp.einsum('cm,bml->bcl', ww, y_w))   # (B, C, W)
    return x * s_h[:, :, :, None] * s_w[:, :, None, :]


if __name__ == "__main__":
    # Small shapes consistent with the module: channel=32, reduction=8 -> mid=4.
    B, C, H, W = 2, 32, 16, 16
    reduction = 8
    mid = C // reduction

    key = jax.random.PRNGKey(0)
    kx, k1, k2, k3, k4, k5 = jax.random.split(key, 6)

    x = jax.random.normal(kx, (B, C, H, W), dtype=jnp.float32)

    # Deterministic synthetic parameters (shapes follow the module __init__,
    # with the 1x1-conv weights squeezed to 2-D).
    w1 = jax.random.normal(k1, (mid, C), dtype=jnp.float32) * 0.1   # conv_1x1
    wh = jax.random.normal(k2, (C, mid), dtype=jnp.float32) * 0.1   # F_h
    ww = jax.random.normal(k3, (C, mid), dtype=jnp.float32) * 0.1   # F_w
    bn_gamma = 1.0 + 0.1 * jax.random.normal(k4, (mid,), dtype=jnp.float32)
    bn_beta = 0.1 * jax.random.normal(k5, (mid,), dtype=jnp.float32)
    bn_mean = jnp.zeros((mid,), dtype=jnp.float32)
    bn_var = jnp.ones((mid,), dtype=jnp.float32)

    out = ca_block_pallas(x, w1, bn_gamma, bn_beta, bn_mean, bn_var, wh, ww)
    out = jax.block_until_ready(out)

    ref = ca_block_reference(x, w1, bn_gamma, bn_beta, bn_mean, bn_var, wh, ww)
    assert out.shape == (B, C, H, W)
    assert jnp.allclose(out, ref, atol=2e-5, rtol=2e-5), "mismatch vs reference"

    print("KERNEL_OK")
</pallas_src>

<mosaic_0001>
module attributes {stable_mosaic.version = 11 : i64} {
  func.func @_ca_block_kernel(%arg0: i32, %arg1: memref<1x32x256xf32, #tpu.memory_space<vmem>>, %arg2: memref<4x32xf32, #tpu.memory_space<vmem>>, %arg3: memref<4x1xf32, #tpu.memory_space<vmem>>, %arg4: memref<32x4xf32, #tpu.memory_space<vmem>>, %arg5: memref<32x4xf32, #tpu.memory_space<vmem>>, %arg6: memref<1x32x256xf32, #tpu.memory_space<vmem>>) attributes {dimension_semantics = [#tpu.dimension_semantics<parallel>], iteration_bounds = array<i64: 2>, scalar_prefetch = 0 : i64, scratch_operands = 0 : i64, tpu.core_type = #tpu.core_type<tc>, window_params = [{transform_indices = @transform_0, window_bounds = array<i64: 1, 32, 256>}, {pipeline_mode = #tpu.pipeline_mode<synchronous>, transform_indices = @transform_1, window_bounds = array<i64: 4, 32>}, {pipeline_mode = #tpu.pipeline_mode<synchronous>, transform_indices = @transform_2, window_bounds = array<i64: 4, 1>}, {pipeline_mode = #tpu.pipeline_mode<synchronous>, transform_indices = @transform_3, window_bounds = array<i64: 32, 4>}, {pipeline_mode = #tpu.pipeline_mode<synchronous>, transform_indices = @transform_4, window_bounds = array<i64: 32, 4>}, {transform_indices = @transform_5, window_bounds = array<i64: 1, 32, 256>}]} {
    %c0 = arith.constant 0 : index
    %c0_0 = arith.constant 0 : index
    %0 = vector.load %arg2[%c0, %c0_0] : memref<4x32xf32, #tpu.memory_space<vmem>>, vector<4x32xf32>
    %c0_1 = arith.constant 0 : index
    %c0_2 = arith.constant 0 : index
    %1 = vector.load %arg4[%c0_1, %c0_2] : memref<32x4xf32, #tpu.memory_space<vmem>>, vector<32x4xf32>
    %c0_3 = arith.constant 0 : index
    %c0_4 = arith.constant 0 : index
    %2 = vector.load %arg5[%c0_3, %c0_4] : memref<32x4xf32, #tpu.memory_space<vmem>>, vector<32x4xf32>
    %c0_5 = arith.constant 0 : index
    %c0_6 = arith.constant 0 : index
    %3 = vector.load %arg3[%c0_5, %c0_6] : memref<4x1xf32, #tpu.memory_space<vmem>>, vector<4x1xf32>
    %4 = vector.shape_cast %3 : vector<4x1xf32> to vector<4x1xf32>
    %5 = vector.broadcast %4 : vector<4x1xf32> to vector<4x16xf32>
    %6 = vector.shape_cast %3 : vector<4x1xf32> to vector<4x1xf32>
    %7 = vector.broadcast %6 : vector<4x1xf32> to vector<4x16xf32>
    %8 = tpu.iota {dimensions = array<i32: 1>} : vector<16x256xi32>
    %9 = tpu.iota {dimensions = array<i32: 0>} : vector<16x256xi32>
    %c16_i32 = arith.constant 16 : i32
    %10 = vector.broadcast %c16_i32 : i32 to vector<16x256xi32>
    %11 = arith.muli %9, %10 : vector<16x256xi32>
    %12 = arith.cmpi sge, %8, %11 : vector<16x256xi32>
    %c16_i32_7 = arith.constant 16 : i32
    %13 = vector.broadcast %c16_i32_7 : i32 to vector<16x256xi32>
    %14 = arith.muli %9, %13 : vector<16x256xi32>
    %c16_i32_8 = arith.constant 16 : i32
    %15 = vector.broadcast %c16_i32_8 : i32 to vector<16x256xi32>
    %16 = arith.addi %14, %15 : vector<16x256xi32>
    %17 = arith.cmpi slt, %8, %16 : vector<16x256xi32>
    %18 = arith.andi %12, %17 : vector<16x256xi1>
    %19 = arith.extui %18 : vector<16x256xi1> to vector<16x256xi32>
    %20 = arith.sitofp %19 : vector<16x256xi32> to vector<16x256xf32>
    %21 = tpu.iota {dimensions = array<i32: 1>} : vector<16x256xi32>
    %22 = arith.sitofp %21 : vector<16x256xi32> to vector<16x256xf32>
    %23 = tpu.iota {dimensions = array<i32: 0>} : vector<16x256xi32>
    %24 = arith.sitofp %23 : vector<16x256xi32> to vector<16x256xf32>
    %cst = arith.constant 1.600000e+01 : f32
    %25 = vector.broadcast %cst : f32 to vector<16x256xf32>
    %26 = arith.divf %22, %25 : vector<16x256xf32>
    %27 = math.floor %26 : vector<16x256xf32>
    %cst_9 = arith.constant 1.600000e+01 : f32
    %28 = vector.broadcast %cst_9 : f32 to vector<16x256xf32>
    %29 = arith.mulf %27, %28 : vector<16x256xf32>
    %30 = arith.subf %22, %29 : vector<16x256xf32>
    %31 = arith.cmpf oeq, %30, %24 : vector<16x256xf32>
    %32 = arith.extui %31 : vector<16x256xi1> to vector<16x256xi32>
    %33 = arith.sitofp %32 : vector<16x256xi32> to vector<16x256xf32>
    %c0_10 = arith.constant 0 : index
    %c0_11 = arith.constant 0 : index
    %c0_12 = arith.constant 0 : index
    %34 = vector.load %arg1[%c0_10, %c0_11, %c0_12] : memref<1x32x256xf32, #tpu.memory_space<vmem>>, vector<1x32x256xf32>
    %35 = vector.shape_cast %34 : vector<1x32x256xf32> to vector<32x256xf32>
    %cst_13 = arith.constant dense<0.000000e+00> : vector<32x16xf32>
    %36 = tpu.matmul %35, %20, %cst_13 {dimension_numbers = #tpu.dot_dimension_numbers<[1], [1], [0], [0], [0, 0, 1, 0], [], []>} : vector<32x256xf32>, vector<16x256xf32>, vector<32x16xf32> -> vector<32x16xf32>
    %cst_14 = arith.constant 6.250000e-02 : f32
    %37 = vector.broadcast %cst_14 : f32 to vector<32x16xf32>
    %38 = arith.mulf %36, %37 : vector<32x16xf32>
    %cst_15 = arith.constant dense<0.000000e+00> : vector<32x16xf32>
    %39 = tpu.matmul %35, %33, %cst_15 {dimension_numbers = #tpu.dot_dimension_numbers<[1], [1], [0], [0], [0, 0, 1, 0], [], []>} : vector<32x256xf32>, vector<16x256xf32>, vector<32x16xf32> -> vector<32x16xf32>
    %cst_16 = arith.constant 6.250000e-02 : f32
    %40 = vector.broadcast %cst_16 : f32 to vector<32x16xf32>
    %41 = arith.mulf %39, %40 : vector<32x16xf32>
    %cst_17 = arith.constant dense<0.000000e+00> : vector<4x16xf32>
    %42 = tpu.matmul %0, %38, %cst_17 {dimension_numbers = #tpu.dot_dimension_numbers<[1], [0], [0], [1], [0, 0, 1, 1], [], []>} : vector<4x32xf32>, vector<32x16xf32>, vector<4x16xf32> -> vector<4x16xf32>
    %43 = arith.addf %42, %5 : vector<4x16xf32>
    %cst_18 = arith.constant 0.000000e+00 : f32
    %44 = vector.broadcast %cst_18 : f32 to vector<4x16xf32>
    %45 = arith.maximumf %43, %44 : vector<4x16xf32>
    %cst_19 = arith.constant dense<0.000000e+00> : vector<4x16xf32>
    %46 = tpu.matmul %0, %41, %cst_19 {dimension_numbers = #tpu.dot_dimension_numbers<[1], [0], [0], [1], [0, 0, 1, 1], [], []>} : vector<4x32xf32>, vector<32x16xf32>, vector<4x16xf32> -> vector<4x16xf32>
    %47 = arith.addf %46, %7 : vector<4x16xf32>
    %cst_20 = arith.constant 0.000000e+00 : f32
    %48 = vector.broadcast %cst_20 : f32 to vector<4x16xf32>
    %49 = arith.maximumf %47, %48 : vector<4x16xf32>
    %cst_21 = arith.constant dense<0.000000e+00> : vector<32x16xf32>
    %50 = tpu.matmul %1, %45, %cst_21 {dimension_numbers = #tpu.dot_dimension_numbers<[1], [0], [0], [1], [0, 0, 1, 1], [], []>} : vector<32x4xf32>, vector<4x16xf32>, vector<32x16xf32> -> vector<32x16xf32>
    %51 = arith.negf %50 : vector<32x16xf32>
    %52 = math.exp %51 : vector<32x16xf32>
    %cst_22 = arith.constant 1.000000e+00 : f32
    %53 = vector.broadcast %cst_22 : f32 to vector<32x16xf32>
    %54 = arith.addf %53, %52 : vector<32x16xf32>
    %55 = arith.divf %53, %54 : vector<32x16xf32>
    %cst_23 = arith.constant dense<0.000000e+00> : vector<32x16xf32>
    %56 = tpu.matmul %2, %49, %cst_23 {dimension_numbers = #tpu.dot_dimension_numbers<[1], [0], [0], [1], [0, 0, 1, 1], [], []>} : vector<32x4xf32>, vector<4x16xf32>, vector<32x16xf32> -> vector<32x16xf32>
    %57 = arith.negf %56 : vector<32x16xf32>
    %58 = math.exp %57 : vector<32x16xf32>
    %cst_24 = arith.constant 1.000000e+00 : f32
    %59 = vector.broadcast %cst_24 : f32 to vector<32x16xf32>
    %60 = arith.addf %59, %58 : vector<32x16xf32>
    %61 = arith.divf %59, %60 : vector<32x16xf32>
    %cst_25 = arith.constant dense<0.000000e+00> : vector<32x256xf32>
    %62 = tpu.matmul %55, %20, %cst_25 {dimension_numbers = #tpu.dot_dimension_numbers<[1], [0], [0], [1], [0, 0, 1, 1], [], []>} : vector<32x16xf32>, vector<16x256xf32>, vector<32x256xf32> -> vector<32x256xf32>
    %cst_26 = arith.constant dense<0.000000e+00> : vector<32x256xf32>
    %63 = tpu.matmul %61, %33, %cst_26 {dimension_numbers = #tpu.dot_dimension_numbers<[1], [0], [0], [1], [0, 0, 1, 1], [], []>} : vector<32x16xf32>, vector<16x256xf32>, vector<32x256xf32> -> vector<32x256xf32>
    %64 = arith.mulf %62, %63 : vector<32x256xf32>
    %65 = arith.mulf %35, %64 : vector<32x256xf32>
    %c0_27 = arith.constant 0 : index
    %c0_28 = arith.constant 0 : index
    %c0_29 = arith.constant 0 : index
    %66 = vector.load %arg6[%c0_27, %c0_28, %c0_29] : memref<1x32x256xf32, #tpu.memory_space<vmem>>, vector<1x32x256xf32>
    %67 = vector.shape_cast %66 : vector<1x32x256xf32> to vector<32x256xf32>
    %68 = vector.shape_cast %65 : vector<32x256xf32> to vector<1x32x256xf32>
    tpu.vector_store %arg6[%c0_27, %c0_28, %c0_29], %68 {strides = array<i32>} : memref<1x32x256xf32, #tpu.memory_space<vmem>>, vector<1x32x256xf32>,
    return
  }
  func.func @transform_0(%arg0: i32) -> (i32, i32, i32) {
    %c0_i32 = arith.constant 0 : i32
    %c0_i32_0 = arith.constant 0 : i32
    %c0_i32_1 = arith.constant 0 : i32
    return %arg0, %c0_i32, %c0_i32_0 : i32, i32, i32
  }
  func.func @transform_1(%arg0: i32) -> (i32, i32) {
    %c0_i32 = arith.constant 0 : i32
    %c0_i32_0 = arith.constant 0 : i32
    %c0_i32_1 = arith.constant 0 : i32
    return %c0_i32, %c0_i32_0 : i32, i32
  }
  func.func @transform_2(%arg0: i32) -> (i32, i32) {
    %c0_i32 = arith.constant 0 : i32
    %c0_i32_0 = arith.constant 0 : i32
    %c0_i32_1 = arith.constant 0 : i32
    return %c0_i32, %c0_i32_0 : i32, i32
  }
  func.func @transform_3(%arg0: i32) -> (i32, i32) {
    %c0_i32 = arith.constant 0 : i32
    %c0_i32_0 = arith.constant 0 : i32
    %c0_i32_1 = arith.constant 0 : i32
    return %c0_i32, %c0_i32_0 : i32, i32
  }
  func.func @transform_4(%arg0: i32) -> (i32, i32) {
    %c0_i32 = arith.constant 0 : i32
    %c0_i32_0 = arith.constant 0 : i32
    %c0_i32_1 = arith.constant 0 : i32
    return %c0_i32, %c0_i32_0 : i32, i32
  }
  func.func @transform_5(%arg0: i32) -> (i32, i32, i32) {
    %c0_i32 = arith.constant 0 : i32
    %c0_i32_0 = arith.constant 0 : i32
    %c0_i32_1 = arith.constant 0 : i32
    return %arg0, %c0_i32, %c0_i32_0 : i32, i32, i32
  }
}

</mosaic_0001>

<bundles_post_ra>
// kernel: tpu_custom_call.1
= control target key start
LH: loop header
LB: loop body
LE: loop exit
PB: predicated region body
PF: predicated region fallthrough
CT: control target
= control target key end

     0   :  { %10 = vsyncpa [#allocation3], 0  ;;  %s1923_s0 = inlined_call_operand.hbm [shape: f32[2,32,256], index: 0, kind: input, shape index: {}]   ;;  %s1924_s1 = inlined_call_operand.vmem [shape: f32[4,32], index: 1, kind: input, shape index: {}]   ;;  %s1925_s2 = inlined_call_operand.vmem [shape: f32[4,1], index: 2, kind: input, shape index: {}]   ;;  %s1926_s3 = inlined_call_operand.vmem [shape: f32[32,4], index: 3, kind: input, shape index: {}]   ;;  %s1927_s4 = inlined_call_operand.vmem [shape: f32[32,4], index: 4, kind: input, shape index: {}]   ;;  %s1928_s5 = inlined_call_operand.hbm [shape: f32[2,32,256], index: 5, kind: output, shape index: {}]  }
   0x1   :  { %12 = vsyncpa [#allocation3 + $0x1], 0 }
   0x2   :  { %13 = vsyncpa [#allocation4], 0 }
   0x3   :  { %15 = vsyncpa [#allocation4 + $0x1], 0  ;;  %s1556_s18 = smov 0   ;;  %s1558_s19 = smov 0  }
   0x4   :  { %s1560_s20 = smov 0   ;;  %s1562_s21 = smov 0  }
   0x5 LB: > { %s1577_s22 = sadd.s32 4294967295, %s1514_s21   ;;  %s1209_s23 = sadd.s32 4294967294, %s1514_s21   ;;  %s1514_s21 = sphi %s1562_s21, %s1959_s21   ;;  %s1510_s20 = sphi %s1560_s20, %s1958_s20   ;;  %s1506_s19 = sphi %s1558_s19, %s1957_s19   ;;  %s1502_s18 = sphi %s1556_s18, %s1956_s18  }
   0x6   : > { %s1581_s24 = sadd.s32 1, %s1514_s21   ;;  %s28_s25 = sadd.s32 1, %s1510_s20 }
   0x7   : > { %s25_s26 = ssub.s32 %s1514_s21, %s1581_s24  ;;  %p35_p0 = scmp.ne.s32.totalorder %s1510_s20, %s1506_s19 }
   0x8   : > { %p26_p1 = scmp.eq.s32.totalorder %s25_s26, 0  ;;  %p36_p2 = scmp.eq.s32.totalorder %s1514_s21, 0 }
   0x9   : > { %p41_p3 = scmp.ne.s32.totalorder %s1506_s19, %s1502_s18  ;;  %p42_p4 = scmp.eq.s32.totalorder %s1577_s22, 0 }
   0xa   : > { %s1593_s27 = scalar_select %p26_p1, %s1510_s20, %s28_s25  }
   0xb   : > { %p1595_p5 = por %p36_p2, %p35_p0  ;;  %p1599_p6 = por %p42_p4, %p41_p3 }
   0xc   : > { %p149_p7 = scmp.eq.s32.totalorder %s1577_s22, 1  ;;  %p155_p8 = scmp.eq.s32.totalorder %s1209_s23, 1 }
   0xd   : > { %s1932_s29 = scalar_select %p1599_p6, 1, 0 }
   0xe   : > { %p1347_p10 = scmp.lt.s32.totalorder %s1514_s21, 2  ;;  %p1606_p11 = por %p149_p7, %p35_p0 }
   0xf   : > { %p1610_p12 = por %p155_p8, %p41_p3  ;;  %s187_s7 = sand.u32 1, %s1510_s20  }
  0x10   : > { %s1933_s30 = scalar_select %p1606_p11, 1, 0 }
  0x11   : > { %s1934_s6 = scalar_select %p1610_p12, 1, 0 }
  0x12   : > { %s1275_s8 = sshll.u32 %s1514_s21, 10  ;;  %s1212_s9 = sshll.u32 %s187_s7, 6 }
  0x13   : > { %s1619_s12 = scalar_lea.hbm %s1923_s0, %s1275_s8  ;;  %s191_s13 = scalar_lea.vmem [#allocation2], %s1212_s9 }
  0x14   : > { %s198_s14 = sshll.u32 %s191_s13, 4  ;;  %p1623_p13 = pnand %p1347_p10, %p1595_p5  ;;  %s1627_s14 = int_to_ptr.vmem [resolvable:$true] %s198_s14 }
  0x15   : > { %s1629_s16 = scalar_lea.sflag [#allocation3], %s187_s7  ;;  %s1422_s17 = scalar_lea.hbm %s1619_s12, 1024 }
  0x16   : > { %p1423_p0 = scmp.ne.s32.totalorder %s1619_s12, %s1422_s17  ;;  %p1424_p1 = pneg %p1623_p13 }
  0x17   : > { %s1427_s26 = scalar_lea.hbm %s1923_s0, 2048  ;;  %p1428_p4 = scmp.lt.s32.totalorder %s1619_s12, %s1923_s0 }
  0x18   : > { %p1425_p2 = pnand %p1424_p1, %p1423_p0  ;;  %p1429_p5 = scmp.lt.s32.totalorder %s1427_s26, %s1422_s17 }
  0x1a   : > { %p1426_p3 = pneg %p1425_p2  ;;  %p1430_p7 = por %p1429_p5, %p1428_p4 }
  0x1c   : > { %p1431_p8 = pnand %p1430_p7, %p1426_p3 }
  0x1e   : > { %1434 = shalt.err (!%p1431_p8)
}
  0x1f   : > { %s1435_s7 = scalar_lea.vmem %s1627_s14, 1024  ;;  %s1516_s9 = smov [#allocation2]  }
  0x20   : > { %p1436_p10 = scmp.ne.s32.totalorder %s1627_s14, %s1435_s7  ;;  %s1440_s10 = sshll.u32 %s1516_s9, 4  ;;  %s1441_s10 = int_to_ptr.vmem [resolvable:$false] %s1440_s10 }
  0x21   : > { %s1442_s11 = scalar_lea.vmem %s1441_s10, 2048  ;;  %p1443_p2 = scmp.lt.s32.totalorder %s1627_s14, %s1441_s10 }
  0x22   : > { %p1438_p9 = pnand %p1436_p10, %p1424_p1  ;;  %p1444_p12 = scmp.lt.s32.totalorder %s1442_s11, %s1435_s7 }
  0x24   : > { %p1439_p0 = pneg %p1438_p9  ;;  %p1445_p11 = por %p1444_p12, %p1443_p2 }
  0x26   : > { %p1446_p6 = pnand %p1445_p11, %p1439_p0 }
  0x28   : > { %1449 = shalt.err (!%p1446_p6)
}
  0x29   : > { %s1517_s13 = smov 256   ;;  %s1518_s17 = smov 16  }
  0x2a   : > { %1342 = dma.hbm_to_vmem [thread:$0]  (!%p1623_p13), %s1619_s12, 1024, %s1627_s14, %s1629_s16, %s1517_s13, %s1517_s13, %s1518_s17  }
  0x2b   : > { %p1215_p9 = scmp.ge.s32.totalorder %s1514_s21, 1  ;;  %p206_p1 = scmp.lt.s32.totalorder %s1514_s21, 3 }
  0x2d   : > { %p207_p3 = pnand %p1215_p9, %p206_p1 }
  0x2e   : > { %s1653_s23 = sand.u32 (!%p207_p3), 1, %s1506_s19   ;;  %p1936_p6 = scmp.ne.s32.totalorder (!%p207_p3), %s1932_s29, 0 }
  0x2f   : > { %210 = sbr.rel (%p207_p3) target bundleno = 944 (0x3b0), region = 40  ;;  %s1216_s25 = sshll.u32 (!%p207_p3), %s1653_s23, 6 }
  0x30   : > { %s213_s26 = scalar_lea.sflag (!%p207_p3), [#allocation3], %s1653_s23  ;;  %s1659_s28 = scalar_lea.vmem (!%p207_p3), [#allocation2], %s1216_s25 }
  0x34   : > { %1493 = dma.done.wait (%p1936_p6), %s213_s26, 1024  }
  0x35   : > { %1495 = vsyncadd (%p1936_p6), %s213_s26, 4294966272  ;;  %v258_v0 = vlaneseq  ;;  %v1666_v11 = vld [vmem:[%s1659_s28 + $0x8] sm:$0xff]  ;;  %v1519_v19 = vmov 1.0   ;;  %v1707_v29 = vld [vmem:[%s1659_s28] sm:$0xff]  ;;  %v1520_v38 = vmov 0.0   ;;  %v1522_v40 = vmov 0  }
  0x36   : > { %385 = vmatprep.mubr.f32.mxu0 %v1666_v11  ;;  %474 = vmatprep.mubr.f32.mxu1 %v1666_v11  ;;  %v1717_v31 = vld [vmem:[%s1659_s28 + $0x18] sm:$0xff]  ;;  %v1732_v33 = vld [vmem:[%s1659_s28 + $0x10] sm:$0xff]  ;;  %v1735_v34 = vld [vmem:[%s1659_s28 + $0x28] sm:$0xff]  ;;  %s1856_s7 = scalar_lea.vmem [#allocation5], %s1216_s25  ;;  %s1276_s9 = sshll.u32 %s1577_s22, 10 }
  0x37   : > { %v259_v1 = vand.u32 127, %v258_v0  ;;  %v262_v2 = vshrl.u32 %v258_v0, 7  ;;  %v1743_v35 = vld [vmem:[%s1659_s28 + $0x20] sm:$0xff]  ;;  %v1747_v36 = vld [vmem:[%s1659_s28 + $0x38] sm:$0xff]  ;;  %v1753_v37 = vld [vmem:[%s1659_s28 + $0x30] sm:$0xff]  ;;  %1389 = vset.pattern.permute.xlu0 %v1522_v40  ;;  %s1136_s25 = sshll.u32 %s1856_s7, 4  ;;  %s1877_s13 = scalar_lea.hbm %s1928_s5, %s1276_s9  ;;  %s1870_s25 = int_to_ptr.vmem [resolvable:$true] %s1136_s25 }
  0x38   : > { %v252_v39 = vld [vmem:[%s1925_s2] sm:$0xf]  ;;  %v249_v16 = vld [vmem:[%s1927_s4 + $0x8] sm:$0xff]  ;;  %v250_v20 = vld [vmem:[%s1927_s4 + $0x10] sm:$0xff]  ;;  %s1123_s22 = scalar_lea.sflag [#allocation4], %s1653_s23  ;;  %s1450_s17 = scalar_lea.vmem %s1870_s25, 1024 }
  0x39   : > { %v260_v3 = vadd.s32 128, %v259_v1  ;;  %v263_v4 = vadd.s32 8, %v262_v2  ;;  %v264_v5 = vmul.u32 16, %v262_v2  ;;  %v288_v6 = vcvt.s32.f32 %v259_v1  ;;  %255 = vperm.xlu0 %1389, %v252_v39   ;;  %v243_v61 = vld [vmem:[%s1924_s1] sm:$0xf]  ;;  %v251_v15 = vld [vmem:[%s1927_s4 + $0x18] sm:$0xff]  ;;  %p1451_p11 = scmp.ne.s32.totalorder %s1870_s25, %s1450_s17 }
  0x3a   : > { %v290_v24 = vcvt.s32.f32 %v262_v2  ;;  %v244_v2 = vld [vmem:[%s1926_s3] sm:$0xff]  ;;  %p1953_p12 = scmp.ne.s32.totalorder %s1933_s30, 0  ;;  %s1523_s26 = smov [#allocation5]  }
  0x3b   : > { %v265_v7 = vmul.u32 16, %v263_v4  ;;  %v270_v8 = vadd.s32 16, %v264_v5  ;;  %vm267_vm0 = vcmp.ge.s32.totalorder %v260_v3, %v264_v5  ;;  %v289_v9 = vcvt.s32.f32 %v260_v3  ;;  %s1454_s28 = sshll.u32 %s1523_s26, 4  ;;  %s1455_s28 = int_to_ptr.vmem [resolvable:$false] %s1454_s28 }
  0x3c   : > { %v293_v10 = vmul.f32 0.0625, %v288_v6  ;;  %vm266_vm8 = vcmp.ge.s32.totalorder %v259_v1, %v264_v5  ;;  %v291_v21 = vcvt.s32.f32 %v263_v4  ;;  %p1452_p13 = pnand %p1451_p11, %p1953_p12  ;;  %s1456_s29 = scalar_lea.vmem %s1455_s28, 2048 }
  0x3d   : > { %vm269_vm1 = vcmp.ge.s32.totalorder %v260_v3, %v265_v7  ;;  %v271_v12 = vadd.s32 16, %v265_v7  ;;  %vm273_vm2 = vcmp.lt.s32.totalorder %v260_v3, %v270_v8  ;;  %vm268_vm3 = vcmp.ge.s32.totalorder %v259_v1, %v265_v7  ;;  %p1457_p5 = scmp.lt.s32.totalorder %s1870_s25, %s1455_s28  ;;  %p1458_p7 = scmp.lt.s32.totalorder %s1456_s29, %s1450_s17 }
  0x3e   : > { %v294_v13 = vmul.f32 0.0625, %v289_v9  ;;  %v295_v14 = vfloor.f32 %v293_v10  ;;  %vm1670_vm6 = vmand %vm267_vm0, %vm273_vm2  ;;  %vm272_vm9 = vcmp.lt.s32.totalorder %v259_v1, %v270_v8  ;;  %vm1521_vm0 = vmmov 0   ;;  %v246_v10 = vld [vmem:[%s1926_s3 + $0x10] sm:$0xff]  ;;  %p1453_p4 = pneg %p1452_p13 }
  0x3f   : > { %vm275_vm4 = vcmp.lt.s32.totalorder %v260_v3, %v271_v12  ;;  %vm274_vm5 = vcmp.lt.s32.totalorder %v259_v1, %v271_v12  ;;  %vm1691_vm11 = vmand %vm266_vm8, %vm272_vm9  ;;  %vm645_vm2 = vcmask 31744   ;;  %v248_v3 = vld [vmem:[%s1927_s4] sm:$0xff]  ;;  %p1459_p8 = por %p1458_p7, %p1457_p5 }
  0x40   : > { %vm1674_vm7 = vmand %vm269_vm1, %vm275_vm4  ;;  %v296_v17 = vfloor.f32 %v294_v13  ;;  %v297_v18 = vmul.f32 16.0, %v295_v14  ;;  %vm499_vm1 = vcmask 261120   ;;  %vm895_vm4 = vcmask 130048  }
  0x41   : > { %1226 = vmatprep.subr.msk.mxu0 %vm1674_vm7, %v1519_v19  ;;  %vm1681_vm10 = vmand %vm268_vm3, %vm274_vm5  ;;  %vm658_vm3 = vcmask 1043456   ;;  %p1460_p10 = pnand %p1459_p8, %p1453_p4 }
  0x42   : > { %1227 = vmatpush1.xpose.msk.msra.mxu0 %vm1681_vm10, %v1519_v19  ;;  %v298_v22 = vmul.f32 16.0, %v296_v17  ;;  %v299_v23 = vsub.f32 %v288_v6, %v297_v18  ;;  %v247_v17 = vld [vmem:[%s1926_s3 + $0x18] sm:$0xff] }
  0x43   : > { %1228 = vmatprep.subr.msk.mxu0 %vm1670_vm6, %v1519_v19 }
  0x44   : > { %v300_v26 = vsub.f32 %v289_v9, %v298_v22  ;;  %vm1695_vm12 = vcmp.eq.f32.partialorder %v299_v23, %v291_v21  ;;  %vm1726_vm15 = vcmp.eq.f32.partialorder %v299_v23, %v290_v24  ;;  %v245_v9 = vld [vmem:[%s1926_s3 + $0x8] sm:$0xff] }
  0x46   : > { %1229 = vmatpush1.xpose.msk.msra.mxu0 %vm1691_vm11, %v1519_v19  ;;  %vm1702_vm13 = vcmp.eq.f32.partialorder %v300_v26, %v291_v21  ;;  %vm1709_vm14 = vcmp.eq.f32.partialorder %v300_v26, %v290_v24 }
  0x47   : > { %1230 = vmatprep.subr.msk.mxu1 %vm1702_vm13, %v1519_v19  ;;  %1297 = vmatprep.subr.mxu0 %v1520_v38 }
  0x48   : > { %1231 = vmatpush1.xpose.msk.msra.mxu1 %vm1695_vm12, %v1519_v19 }
  0x49   : > { %386 = vmatmul.mubr.f32.vlgmr.msra.gmra.mxu0 %v1707_v29  ;;  %1232 = vmatprep.subr.msk.mxu1 %vm1709_vm14, %v1519_v19 }
  0x4a   : > { %390 = vmatprep.mubr.f32.mxu0 %v1717_v31 }
  0x4c   : > { %1233 = vmatpush1.xpose.msk.msra.mxu1 %vm1726_vm15, %v1519_v19 }
  0x4d   : > { %391 = vmatmul.mubr.f32.gmra.mxu0 %v1732_v33  ;;  %1308 = vmatprep.subr.mxu1 %v1520_v38 }
  0x4e   : > { %395 = vmatprep.mubr.f32.mxu0 %v1735_v34 }
  0x4f   : > { %475 = vmatmul.mubr.f32.vlgmr.msra.gmra.mxu1 %v1707_v29 }
  0x50   : > { %479 = vmatprep.mubr.f32.mxu1 %v1717_v31 }
  0x51   : > { %396 = vmatmul.mubr.f32.gmra.mxu0 %v1743_v35 }
  0x52   : > { %400 = vmatprep.mubr.f32.mxu0 %v1747_v36 }
  0x53   : > { %480 = vmatmul.mubr.f32.gmra.mxu1 %v1732_v33 }
  0x54   : > { %484 = vmatprep.mubr.f32.mxu1 %v1735_v34 }
  0x55   : > { %401 = vmatmul.mubr.f32.gmra.mxu0 %v1753_v37 }
  0x56   : > { %1305 = vmatprep.mubr.msk.f32.mxu0 %vm1521_vm0, %v1520_v38 }
  0x57   : > { %485 = vmatmul.mubr.f32.gmra.mxu1 %v1743_v35 }
  0x58   : > { %489 = vmatprep.mubr.f32.mxu1 %v1747_v36 }
  0x5b   : > { %490 = vmatmul.mubr.f32.gmra.mxu1 %v1753_v37 }
  0x5c   : > { %1316 = vmatprep.mubr.msk.f32.mxu1 %vm1521_vm0, %v1520_v38 }
  0xb4   : > { %v256_v4 = vpop.permute.xlu0 %255 }
 0x109   : > { %v387_v41 = vpop.f32.mrf.mxu0 }
 0x10a   : > { %v406_v59 = vmul.f32 0.0625, %v387_v41 }
 0x10b   : > { %v389_v42 = vpop.f32.mrf.mxu0 }
 0x10d   : > { %v392_v43 = vpop.f32.mrf.mxu0 }
 0x10e   : > { %v407_v57 = vmul.f32 0.0625, %v392_v43 }
 0x10f   : > { %v476_v44 = vpop.f32.mrf.mxu1  ;;  %v394_v45 = vpop.f32.mrf.mxu0 }
 0x110   : > { %v495_v1 = vmul.f32 0.0625, %v476_v44 }
 0x111   : > { %v478_v46 = vpop.f32.mrf.mxu1  ;;  %v397_v47 = vpop.f32.mrf.mxu0 }
 0x112   : > { %v408_v52 = vmul.f32 0.0625, %v397_v47 }
 0x113   : > { %v481_v48 = vpop.f32.mrf.mxu1  ;;  %v399_v49 = vpop.f32.mrf.mxu0 }
 0x114   : > { %v496_v0 = vmul.f32 0.0625, %v481_v48 }
 0x115   : > { %v483_v50 = vpop.f32.mrf.mxu1  ;;  %v402_v51 = vpop.f32.mrf.mxu0 }
 0x116   : > { %v409_v53 = vmul.f32 0.0625, %v402_v51 }
 0x117   : > { %v486_v54 = vpop.f32.mrf.mxu1  ;;  %v404_v55 = vpop.f32.mrf.mxu0 }
 0x118   : > { %1298 = vmatpush3.msra.mxu0 %v409_v53  ;;  %v497_v63 = vmul.f32 0.0625, %v486_v54 }
 0x119   : > { %v488_v56 = vpop.f32.mrf.mxu1  ;;  %1299 = vmatprep.subr.mxu0 %v1520_v38 }
 0x11a   : > { %1300 = vmatpush3.msra.mxu0 %v408_v52 }
 0x11b   : > { %v491_v58 = vpop.f32.mrf.mxu1  ;;  %1301 = vmatprep.subr.mxu0 %v1520_v38 }
 0x11c   : > { %v498_v60 = vmul.f32 0.0625, %v491_v58  ;;  %1302 = vmatpush3.msra.mxu0 %v407_v57 }
 0x11d   : > { %v493_v62 = vpop.f32.mrf.mxu1  ;;  %1303 = vmatprep.subr.mxu0 %v1520_v38 }
 0x11e   : > { %1309 = vmatpush3.msra.mxu1 %v498_v60  ;;  %1304 = vmatpush3.msra.mxu0 %v406_v59 }
 0x11f   : > { %1310 = vmatprep.subr.mxu1 %v1520_v38  ;;  %1306 = vmatmul.mubr.msk.f32.vlgmr.msra.gmra.mxu0 %vm499_vm1, %v243_v61 }
 0x120   : > { %1311 = vmatpush3.msra.mxu1 %v497_v63  ;;  %1321 = vmatprep.mubr.msk.f32.mxu0 %vm645_vm2, %v244_v2 }
 0x121   : > { %1312 = vmatprep.subr.mxu1 %v1520_v38 }
 0x122   : > { %1313 = vmatpush3.msra.mxu1 %v496_v0 }
 0x123   : > { %1314 = vmatprep.subr.mxu1 %v1520_v38 }
 0x124   : > { %1315 = vmatpush3.msra.mxu1 %v495_v1 }
 0x125   : > { %1317 = vmatmul.mubr.msk.f32.vlgmr.msra.gmra.mxu1 %vm499_vm1, %v243_v61 }
 0x126   : > { %1329 = vmatprep.mubr.msk.f32.mxu1 %vm645_vm2, %v248_v3 }
 0x1df   : > { %v569_v5 = vpop.f32.mrf.mxu0 }
 0x1e0   : > { %v570_v6 = vadd.f32 %v569_v5, %v256_v4 }
 0x1e1   : > { %v1307_v7 = vpop.f32.mrf.mxu0 }
 0x1e2   : > { %v573_v8 = vmax.f32 %v570_v6, 0.0 }
 0x1e4   : > { %1319 = vmatprep.subr.msk.mxu0 %vm658_vm3, %v573_v8 }
 0x1e5   : > { %v640_v12 = vpop.f32.mrf.mxu1  ;;  %1320 = vmatpush3.msk.msra.mxu0 %vm658_vm3, %v573_v8 }
 0x1e6   : > { %v641_v13 = vadd.f32 %v640_v12, %v256_v4  ;;  %1322 = vmatmul.mubr.msk.f32.vlgmr.msra.gmra.mxu0 %vm645_vm2, %v245_v9  ;;  %1254 = vmatprep.subr.msk.mxu0 %vm1674_vm7, %v1519_v19 }
 0x1e7   : > { %v1318_v14 = vpop.f32.mrf.mxu1  ;;  %1324 = vmatprep.mubr.msk.f32.mxu0 %vm645_vm2, %v246_v10  ;;  %1255 = vmatpush1.msk.msra.mxu0 %vm1681_vm10, %v1519_v19 }
 0x1e8   : > { %v644_v18 = vmax.f32 %v641_v13, 0.0  ;;  %1256 = vmatprep.subr.msk.mxu0 %vm1670_vm6, %v1519_v19 }
 0x1e9   : > { %1257 = vmatpush1.msk.msra.mxu0 %vm1691_vm11, %v1519_v19 }
 0x1ea   : > { %1327 = vmatprep.subr.msk.mxu1 %vm658_vm3, %v644_v18  ;;  %1325 = vmatmul.mubr.msk.f32.gmra.mxu0 %vm645_vm2, %v247_v17 }
 0x1eb   : > { %1328 = vmatpush3.msk.msra.mxu1 %vm658_vm3, %v644_v18  ;;  %972 = vmatprep.mubr.f32.mxu0 %v1520_v38 }
 0x1ec   : > { %1330 = vmatmul.mubr.msk.f32.vlgmr.msra.gmra.mxu1 %vm645_vm2, %v249_v16  ;;  %1262 = vmatprep.subr.msk.mxu1 %vm1702_vm13, %v1519_v19 }
 0x1ed   : > { %1332 = vmatprep.mubr.msk.f32.mxu1 %vm645_vm2, %v250_v20  ;;  %1263 = vmatpush1.msk.msra.mxu1 %vm1695_vm12, %v1519_v19 }
 0x1ee   : > { %1264 = vmatprep.subr.msk.mxu1 %vm1709_vm14, %v1519_v19 }
 0x1ef   : > { %1265 = vmatpush1.msk.msra.mxu1 %vm1726_vm15, %v1519_v19 }
 0x1f0   : > { %1333 = vmatmul.mubr.msk.f32.gmra.mxu1 %vm645_vm2, %v251_v15 }
 0x1f1   : > { %1073 = vmatprep.mubr.f32.mxu1 %v1520_v38 }
 0x2a6   : > { %v1323_v21 = vpop.f32.mrf.mxu0 }
 0x2a7   : > { %v1242_v22 = vmul.f32 -1.442695, %v1323_v21 }
 0x2a8   : > { %v728_v23 = vpop.f32.mrf.mxu0 }
 0x2a9   : > { %1390 = vpow2.f32 %v1242_v22  ;;  %v1241_v24 = vmul.f32 -1.442695, %v728_v23 }
 0x2aa   : > { %v1326_v25 = vpop.f32.mrf.mxu0 }
 0x2ab   : > { %1392 = vpow2.f32 %v1241_v24  ;;  %v1244_v26 = vmul.f32 -1.442695, %v1326_v25 }
 0x2ac   : > { %v1331_v27 = vpop.f32.mrf.mxu1  ;;  %v738_v28 = vpop.f32.mrf.mxu0 }
 0x2ad   : > { %v1251_v30 = vmul.f32 -1.442695, %v1331_v27  ;;  %v1243_v39 = vmul.f32 -1.442695, %v738_v28  ;;  %1394 = vpow2.f32 %v1244_v26 }
 0x2ae   : > { %v852_v40 = vpop.f32.mrf.mxu1 }
 0x2af   : > { %1396 = vpow2.f32 %v1251_v30  ;;  %v1250_v19 = vmul.f32 -1.442695, %v852_v40 }
 0x2b0   : > { %v1334_v32 = vpop.f32.mrf.mxu1  ;;  %1398 = vpow2.f32 %v1243_v39 }
 0x2b1   : > { %1400 = vpow2.f32 %v1250_v19  ;;  %v1253_v43 = vmul.f32 -1.442695, %v1334_v32 }
 0x2b2   : > { %v862_v41 = vpop.f32.mrf.mxu1 }
 0x2b3   : > { %v1252_v42 = vmul.f32 -1.442695, %v862_v41 }
 0x2b5   : > { %1402 = vpow2.f32 %v1252_v42 }
 0x2b6   : > { %v1391_v44 = vpop.eup %1390  ;;  %1404 = vpow2.f32 %v1253_v43 }
 0x2b7   : > { %v760_v46 = vadd.f32 1.0, %v1391_v44 }
 0x2b8   : > { %v1393_v45 = vpop.eup %1392 }
 0x2b9   : > { %v759_v47 = vadd.f32 1.0, %v1393_v45 }
 0x2ba   : > { %v1395_v48 = vpop.eup %1394 }
 0x2bb   : > { %1406 = vrcp.f32 %v759_v47  ;;  %v762_v54 = vadd.f32 1.0, %v1395_v48 }
 0x2bc   : > { %v1397_v49 = vpop.eup %1396  ;;  %1408 = vrcp.f32 %v760_v46 }
 0x2bd   : > { %v1399_v50 = vpop.eup %1398  ;;  %v884_v55 = vadd.f32 1.0, %v1397_v49 }
 0x2be   : > { %v1401_v51 = vpop.eup %1400  ;;  %v761_v52 = vadd.f32 1.0, %v1399_v50 }
 0x2bf   : > { %v883_v53 = vadd.f32 1.0, %v1401_v51 }
 0x2c0   : > { %1410 = vrcp.f32 %v761_v52 }
 0x2c1   : > { %1412 = vrcp.f32 %v883_v53 }
 0x2c2   : > { %v1403_v56 = vpop.eup %1402  ;;  %1414 = vrcp.f32 %v762_v54 }
 0x2c3   : > { %1416 = vrcp.f32 %v884_v55  ;;  %v885_v57 = vadd.f32 1.0, %v1403_v56  ;;  %v1405_v58 = vpop.eup %1404 }
 0x2c4   : > { %v886_v60 = vadd.f32 1.0, %v1405_v58 }
 0x2c5   : > { %1418 = vrcp.f32 %v885_v57 }
 0x2c6   : > { %1420 = vrcp.f32 %v886_v60 }
 0x2c8   : > { %v1407_v59 = vpop.eup %1406 }
 0x2c9   : > { %1258 = vmatmul.mubr.msk.f32.vlgmr.msra.gmra.mxu0 %vm895_vm4, %v1407_v59  ;;  %v1409_v61 = vpop.eup %1408 }
 0x2ca   : > { %978 = vmatprep.mubr.f32.mxu0 %v1520_v38 }
 0x2cd   : > { %v1411_v62 = vpop.eup %1410  ;;  %1259 = vmatmul.mubr.msk.f32.gmra.mxu0 %vm895_vm4, %v1409_v61 }
 0x2ce   : > { %v1413_v63 = vpop.eup %1412  ;;  %984 = vmatprep.mubr.f32.mxu0 %v1520_v38 }
 0x2cf   : > { %1266 = vmatmul.mubr.msk.f32.vlgmr.msra.gmra.mxu1 %vm895_vm4, %v1413_v63  ;;  %v1415_v0 = vpop.eup %1414 }
 0x2d0   : > { %1079 = vmatprep.mubr.f32.mxu1 %v1520_v38  ;;  %v1417_v1 = vpop.eup %1416 }
 0x2d1   : > { %1260 = vmatmul.mubr.msk.f32.gmra.mxu0 %vm895_vm4, %v1411_v62 }
 0x2d2   : > { %990 = vmatprep.mubr.f32.mxu0 %v1520_v38  ;;  %v1419_v2 = vpop.eup %1418 }
 0x2d3   : > { %1267 = vmatmul.mubr.msk.f32.gmra.mxu1 %vm895_vm4, %v1417_v1  ;;  %v1421_v3 = vpop.eup %1420 }
 0x2d4   : > { %1085 = vmatprep.mubr.f32.mxu1 %v1520_v38 }
 0x2d5   : > { %1261 = vmatmul.mubr.msk.f32.gmra.mxu0 %vm895_vm4, %v1415_v0 }
 0x2d7   : > { %1268 = vmatmul.mubr.msk.f32.gmra.mxu1 %vm895_vm4, %v1419_v2 }
 0x2d8   : > { %1091 = vmatprep.mubr.f32.mxu1 %v1520_v38 }
 0x2db   : > { %1269 = vmatmul.mubr.msk.f32.gmra.mxu1 %vm895_vm4, %v1421_v3 }
 0x389   : > { %v974_v4 = vpop.f32.mrf.mxu0 }
 0x38b   : > { %v976_v5 = vpop.f32.mrf.mxu0 }
 0x38d   : > { %v980_v6 = vpop.f32.mrf.mxu0 }
 0x38f   : > { %v1075_v7 = vpop.f32.mrf.mxu1  ;;  %v982_v8 = vpop.f32.mrf.mxu0 }
 0x390   : > { %v1098_v9 = vmul.f32 %v1075_v7, %v974_v4 }
 0x391   : > { %v1077_v10 = vpop.f32.mrf.mxu1  ;;  %v986_v12 = vpop.f32.mrf.mxu0 }
 0x392   : > { %v1106_v13 = vmul.f32 %v1098_v9, %v1707_v29  ;;  %v1099_v14 = vmul.f32 %v1077_v10, %v976_v5 }
 0x393   : > { %v1081_v17 = vpop.f32.mrf.mxu1  ;;  %v988_v20 = vpop.f32.mrf.mxu0 }
 0x394   : > { %1114 = vst [vmem:[%s1856_s7] sm:$0xff] %v1106_v13  ;;  %v1107_v38 = vmul.f32 %v1099_v14, %v1666_v11  ;;  %v1100_v18 = vmul.f32 %v1081_v17, %v980_v6 }
 0x395   : > { %v1083_v16 = vpop.f32.mrf.mxu1  ;;  %v992_v25 = vpop.f32.mrf.mxu0 }
 0x396   : > { %1115 = vst [vmem:[%s1856_s7 + $0x8] sm:$0xff] %v1107_v38  ;;  %v1108_v29 = vmul.f32 %v1100_v18, %v1732_v33  ;;  %v1101_v15 = vmul.f32 %v1083_v16, %v982_v8 }
 0x397   : > { %v1087_v21 = vpop.f32.mrf.mxu1 }
 0x398   : > { %1116 = vst [vmem:[%s1856_s7 + $0x10] sm:$0xff] %v1108_v29  ;;  %v1109_v22 = vmul.f32 %v1101_v15, %v1717_v31  ;;  %v1102_v23 = vmul.f32 %v1087_v21, %v986_v12  ;;  %v994_v31 = vpop.f32.mrf.mxu0 }
 0x399   : > { %v1089_v24 = vpop.f32.mrf.mxu1 }
 0x39a   : > { %1117 = vst [vmem:[%s1856_s7 + $0x18] sm:$0xff] %v1109_v22  ;;  %v1110_v11 = vmul.f32 %v1102_v23, %v1743_v35  ;;  %v1103_v26 = vmul.f32 %v1089_v24, %v988_v20 }
 0x39b   : > { %v1093_v27 = vpop.f32.mrf.mxu1 }
 0x39c   : > { %1118 = vst [vmem:[%s1856_s7 + $0x20] sm:$0xff] %v1110_v11  ;;  %v1111_v33 = vmul.f32 %v1103_v26, %v1735_v34  ;;  %v1104_v28 = vmul.f32 %v1093_v27, %v992_v25 }
 0x39d   : > { %v1095_v30 = vpop.f32.mrf.mxu1 }
 0x39e   : > { %1119 = vst [vmem:[%s1856_s7 + $0x28] sm:$0xff] %v1111_v33  ;;  %v1112_v35 = vmul.f32 %v1104_v28, %v1753_v37  ;;  %v1105_v39 = vmul.f32 %v1095_v30, %v994_v31 }
 0x3a0   : > { %1120 = vst [vmem:[%s1856_s7 + $0x30] sm:$0xff] %v1112_v35  ;;  %v1113_v34 = vmul.f32 %v1105_v39, %v1747_v36 }
 0x3a2   : > { %1121 = vst [vmem:[%s1856_s7 + $0x38] sm:$0xff] %v1113_v34 }
 0x3a3   : > { %1463 = shalt.err (!%p1460_p10)
}
 0x3a4   : > { %s1464_s12 = scalar_lea.hbm %s1877_s13, 1024  ;;  %s1468_s16 = scalar_lea.hbm %s1928_s5, 2048 }
 0x3a5   : > { %p1465_p0 = scmp.ne.s32.totalorder %s1877_s13, %s1464_s12  ;;  %p1469_p1 = scmp.lt.s32.totalorder %s1877_s13, %s1928_s5 }
 0x3a6   : > { %p1470_p3 = scmp.lt.s32.totalorder %s1468_s16, %s1464_s12 }
 0x3a7   : > { %p1466_p2 = pnand %p1465_p0, %p1953_p12 }
 0x3a8   : > { %p1471_p6 = por %p1470_p3, %p1469_p1 }
 0x3a9   : > { %p1467_p9 = pneg %p1466_p2 }
 0x3ab   : > { %p1472_p11 = pnand %p1471_p6, %p1467_p9 }
 0x3ad   : > { %1475 = shalt.err (!%p1472_p11)
}
 0x3ae   : > { %s1524_s9 = smov 256   ;;  %s1525_s10 = smov 16  }
 0x3af   : > { %1337 = dma.vmem_to_hbm [thread:$0]  (%p1953_p12), %s1870_s25, 1024, %s1877_s13, %s1123_s22, %s1524_s9, %s1524_s9, %s1525_s10  }
 0x3b0 PF: > { %s1151_s11 = sand.u32 1, %s1502_s18   ;;  %p1954_p13 = scmp.ne.s32.totalorder %s1934_s6, 0 }
 0x3b1   : > { %p1955_p4 = scmp.ge.s32.totalorder %s1514_s21, 2  ;;  %s1152_s17 = scalar_lea.sflag [#allocation4], %s1151_s11 }
 0x3b3   : > { %p1344_p5 = pnand %p1955_p4, %p1954_p13 }
 0x3b5   : > { %p1345_p7 = pneg %p1344_p5 }
 0x3b7   : > { %1497 = dma.done.wait (%p1345_p7), %s1152_s17, 1024  }
 0x3b8   : > { %1499 = vsyncadd (%p1345_p7), %s1152_s17, 4294966272  ;;  %p18_p8 = scmp.ge.s32.totalorder %s1581_s24, 4   ;;  %s1956_s18 = smov %s1506_s19 }
 0x3b9   : > { %s1957_s19 = smov %s1510_s20  ;;  %s1958_s20 = smov %s1593_s27 }
 0x3ba   : > { %s1959_s21 = smov %s1581_s24  ;;  %20 = sbr.rel (!%p18_p8) target bundleno = 5 (0x5), region = 85 }
 0x3bf   :  { %1157 = vsyncpa [#allocation3], 1 }
 0x3c0   :  { %1159 = vsyncpa [#allocation3 + $0x1], 1 }
 0x3c1   :  { %1160 = vsyncpa [#allocation4], 1 }
 0x3c2   :  { %1162 = vsyncpa [#allocation4 + $0x1], 1 }

</bundles_post_ra>
